<compile_context>
chip_gen: v5e
topology: v5e:2x2
jax: 0.10.0
libtpu: 0.0.40
codegen_flags: <defaults>
</compile_context>

<pallas_src>
import functools
import math

import jax
import jax.numpy as jnp
from jax.experimental import pallas as pl
from jax.experimental.pallas import tpu as pltpu


def _round_up(x, m):
    return ((x + m - 1) // m) * m


def _sublane_multiple(dtype):
    # Minimum second-to-last dim packing tile: 8 (32-bit), 16 (16-bit), 32 (8-bit).
    itemsize = jnp.dtype(dtype).itemsize
    return {4: 8, 2: 16, 1: 32}.get(itemsize, 8)


def _default_tiles(dtype):
    # (tm, tn, tk) defaults; N/K tiles are 256-multiples for the 256x256 MXU
    # on v6e/v7x and still fine for v5e's 128x128 MXU.
    if jnp.dtype(dtype).itemsize >= 4:
        return 256, 512, 512       # ~4.2 MiB double-buffered in f32
    return 512, 512, 1024          # bf16/int8: bigger tiles, half the bytes


# ----------------------------- kernels -----------------------------

def _linear_kernel_accum_out(x_ref, w_ref, b_ref, o_ref):
    """f32-output path: accumulate directly into the resident output tile."""
    k = pl.program_id(2)
    partial = jnp.dot(x_ref[...], w_ref[...], preferred_element_type=jnp.float32)

    @pl.when(k == 0)
    def _first():
        # Direct store of the first dot result; bias folded in once here.
        o_ref[...] = partial + b_ref[...].astype(jnp.float32)

    @pl.when(k != 0)
    def _rest():
        o_ref[...] += partial


def _linear_kernel_scratch(x_ref, w_ref, b_ref, o_ref, acc_ref):
    """Low-precision-output path: f32 VMEM accumulator + cast in the epilogue."""
    k = pl.program_id(2)
    partial = jnp.dot(x_ref[...], w_ref[...], preferred_element_type=jnp.float32)

    @pl.when(k == 0)
    def _first():
        acc_ref[...] = partial

    @pl.when(k != 0)
    def _rest():
        acc_ref[...] += partial

    @pl.when(k == pl.num_programs(2) - 1)
    def _finalize():
        o_ref[...] = (acc_ref[...] + b_ref[...].astype(jnp.float32)).astype(o_ref.dtype)


# ----------------------------- forward -----------------------------

@functools.partial(jax.jit, static_argnames=("n_out", "tm", "tn", "tk"))
def _linear_forward(x, w_kn, b2, *, n_out, tm, tn, tk):
    M, K = x.shape
    Kp, Np = w_kn.shape
    out_dtype = x.dtype
    sub = _sublane_multiple(out_dtype)

    # Clamp tm for small M (dtype-aware sublane rounding).
    tm = min(tm, _round_up(M, sub))
    Mp = _round_up(M, tm)

    # v7x megacore: if the parallel (i, j) grid has a single step but M is
    # splittable, halve tm so both TensorCores get work.
    if (Mp // tm) * (Np // tn) < 2 and M > sub:
        tm_half = max(sub, _round_up(tm // 2, sub))
        if _round_up(M, tm_half) // tm_half >= 2:
            tm = tm_half
            Mp = _round_up(M, tm)

    if (Mp, Kp) != (M, K):
        x = jnp.pad(x, ((0, Mp - M), (0, Kp - K)))

    grid = (Mp // tm, Np // tn, Kp // tk)

    if out_dtype == jnp.float32:
        kernel = _linear_kernel_accum_out
        scratch_shapes = []
    else:
        kernel = _linear_kernel_scratch
        scratch_shapes = [pltpu.VMEM((tm, tn), jnp.float32)]

    cost = pl.CostEstimate(
        flops=2 * Mp * Np * Kp,
        transcendentals=0,
        bytes_accessed=(
            Mp * Kp * x.dtype.itemsize * grid[1]        # x re-streamed per N tile
            + Kp * Np * w_kn.dtype.itemsize * grid[0]   # W re-streamed per M tile
            + Np * b2.dtype.itemsize * grid[0]
            + Mp * Np * jnp.dtype(out_dtype).itemsize
        ),
    )

    out = pl.pallas_call(
        kernel,
        out_shape=jax.ShapeDtypeStruct((Mp, Np), out_dtype),
        grid_spec=pltpu.PrefetchScalarGridSpec(
            num_scalar_prefetch=0,
            grid=grid,
            in_specs=[
                pl.BlockSpec((tm, tk), lambda i, j, k: (i, k)),   # x tile
                pl.BlockSpec((tk, tn), lambda i, j, k: (k, j)),   # W^T tile
                pl.BlockSpec((1, tn), lambda i, j, k: (0, j)),    # bias tile
            ],
            out_specs=pl.BlockSpec((tm, tn), lambda i, j, k: (i, j)),
            scratch_shapes=scratch_shapes,
        ),
        compiler_params=pltpu.CompilerParams(
            dimension_semantics=("parallel", "parallel", "arbitrary"),
            vmem_limit_bytes=48 * 1024 * 1024,
        ),
        cost_estimate=cost,
    )(x, w_kn, b2)

    return out[:M, :n_out]


def _prepare_weight_bias(weight, bias, *, tn, tk):
    """One-time weight transpose + pad (hoisted out of the per-call path)."""
    N, K = weight.shape
    Kp, Np = _round_up(K, tk), _round_up(N, tn)
    w_kn = weight.T                       # MXU-natural [K, N] RHS layout
    if (Kp, Np) != (K, N):
        w_kn = jnp.pad(w_kn, ((0, Kp - K), (0, Np - N)))
    if bias is None:
        b2 = jnp.zeros((1, Np), dtype=weight.dtype)
    else:
        b2 = bias.reshape(1, N)
        if Np != N:
            b2 = jnp.pad(b2, ((0, 0), (0, Np - N)))
    return w_kn, b2


class PallasLinear:
    """y = x @ W^T + b with W stored PyTorch-style [outFeatures, inFeatures].

    Weight transpose / padding is performed once at construction and cached,
    so the per-call forward only pads x (if needed) and runs the kernel.
    """

    def __init__(self, weight, bias=None, *, tm=None, tn=None, tk=None):
        N, K = weight.shape
        d_tm, d_tn, d_tk = _default_tiles(weight.dtype)
        self.tm = int(tm) if tm is not None else d_tm
        self.tn = int(tn) if tn is not None else min(d_tn, _round_up(N, 128))
        self.tk = int(tk) if tk is not None else min(d_tk, _round_up(K, 128))
        self.n_out = N
        self.in_features = K
        self.w_kn, self.b2 = _prepare_weight_bias(weight, bias, tn=self.tn, tk=self.tk)

    def __call__(self, x):
        lead = x.shape[:-1]
        x2d = x.reshape(-1, x.shape[-1])
        out = _linear_forward(
            x2d, self.w_kn, self.b2,
            n_out=self.n_out, tm=self.tm, tn=self.tn, tk=self.tk,
        )
        return out.reshape(*lead, self.n_out)


def pallas_linear(x, weight, bias=None, **tile_kwargs):
    """One-shot helper (re-prepares the weight per call; prefer PallasLinear)."""
    return PallasLinear(weight, bias, **tile_kwargs)(x)


def init_linear_params(key, in_features, out_features, dtype=jnp.float32):
    """Replicates Linear.initParams():
       weight ~ kaiming_uniform_(a=sqrt(5)) == U(-1/sqrt(fan_in), 1/sqrt(fan_in))
       bias   ~ U(-1/sqrt(fan_in), 1/sqrt(fan_in))
    """
    kw, kb = jax.random.split(key)
    bound = 1.0 / math.sqrt(in_features)
    weight = jax.random.uniform(
        kw, (out_features, in_features), dtype=dtype, minval=-bound, maxval=bound
    )
    bias = jax.random.uniform(
        kb, (out_features,), dtype=dtype, minval=-bound, maxval=bound
    )
    return weight, bias


if __name__ == "__main__":
    key = jax.random.PRNGKey(0)
    k_x, k_p, k_rest = jax.random.split(key, 3)

    # Small shape consistent with the module's forward: (batch, inFeatures).
    batch, in_features, out_features = 8, 32, 16
    x = jax.random.normal(k_x, (batch, in_features), dtype=jnp.float32)
    weight, bias = init_linear_params(k_p, in_features, out_features)

    layer = PallasLinear(weight, bias)       # weight prep hoisted, done once
    out = layer(x)
    jax.block_until_ready(out)
    ref = x @ weight.T + bias
    assert out.shape == (batch, out_features)
    assert jnp.allclose(out, ref, atol=1e-5, rtol=1e-5)

    # Tile-exercising f32 shape (multiple M tiles after megacore split).
    k_x2, k_p2, k_x3, k_p3 = jax.random.split(k_rest, 4)
    x2 = jax.random.normal(k_x2, (256, 512), dtype=jnp.float32)
    w2, b2 = init_linear_params(k_p2, 512, 384)
    out2 = PallasLinear(w2, b2)(x2)
    jax.block_until_ready(out2)
    ref2 = x2 @ w2.T + b2
    assert jnp.allclose(out2, ref2, atol=1e-4, rtol=1e-3)

    # bf16 operand path (fast MXU path, f32 accumulation, bf16 output via scratch).
    x3 = jax.random.normal(k_x3, (64, 256), dtype=jnp.float32).astype(jnp.bfloat16)
    w3, b3 = init_linear_params(k_p3, 256, 160)
    w3 = w3.astype(jnp.bfloat16)
    b3 = b3.astype(jnp.bfloat16)
    out3 = PallasLinear(w3, b3)(x3)
    jax.block_until_ready(out3)
    ref3 = (x3.astype(jnp.float32) @ w3.T.astype(jnp.float32)
            + b3.astype(jnp.float32))
    assert jnp.allclose(out3.astype(jnp.float32), ref3, atol=2e-2, rtol=2e-2)

    print("KERNEL_OK")
</pallas_src>

<mosaic_0001>
module attributes {stable_mosaic.version = 11 : i64} {
  func.func @_linear_kernel_accum_out(%arg0: i32, %arg1: i32, %arg2: i32, %arg3: memref<8x128xf32, #tpu.memory_space<vmem>>, %arg4: memref<128x128xf32, #tpu.memory_space<vmem>>, %arg5: memref<1x128xf32, #tpu.memory_space<vmem>>, %arg6: memref<8x128xf32, #tpu.memory_space<vmem>>) attributes {dimension_semantics = [#tpu.dimension_semantics<parallel>, #tpu.dimension_semantics<parallel>, #tpu.dimension_semantics<arbitrary>], iteration_bounds = array<i64: 1, 1, 1>, scalar_prefetch = 0 : i64, scratch_operands = 0 : i64, tpu.core_type = #tpu.core_type<tc>, window_params = [{transform_indices = @transform_0, window_bounds = array<i64: 8, 128>}, {transform_indices = @transform_1, window_bounds = array<i64: 128, 128>}, {transform_indices = @transform_2, window_bounds = array<i64: 1, 128>}, {transform_indices = @transform_3, window_bounds = array<i64: 8, 128>}]} {
    %c0 = arith.constant 0 : index
    %c0_0 = arith.constant 0 : index
    %0 = vector.load %arg3[%c0, %c0_0] : memref<8x128xf32, #tpu.memory_space<vmem>>, vector<8x128xf32>
    %c0_1 = arith.constant 0 : index
    %c0_2 = arith.constant 0 : index
    %1 = vector.load %arg4[%c0_1, %c0_2] : memref<128x128xf32, #tpu.memory_space<vmem>>, vector<128x128xf32>
    %cst = arith.constant dense<0.000000e+00> : vector<8x128xf32>
    %2 = tpu.matmul %0, %1, %cst {dimension_numbers = #tpu.dot_dimension_numbers<[1], [0], [0], [1], [0, 0, 1, 1], [], []>} : vector<8x128xf32>, vector<128x128xf32>, vector<8x128xf32> -> vector<8x128xf32>
    %c0_i32 = arith.constant 0 : i32
    %3 = arith.cmpi eq, %arg2, %c0_i32 : i32
    %4 = arith.extui %3 : i1 to i32
    %c0_i32_3 = arith.constant 0 : i32
    %5 = arith.cmpi ne, %4, %c0_i32_3 : i32
    scf.if %5 {
      %c0_6 = arith.constant 0 : index
      %c0_7 = arith.constant 0 : index
      %9 = vector.load %arg5[%c0_6, %c0_7] : memref<1x128xf32, #tpu.memory_space<vmem>>, vector<1x128xf32>
      %10 = vector.broadcast %9 : vector<1x128xf32> to vector<8x128xf32>
      %11 = arith.addf %2, %10 : vector<8x128xf32>
      %c0_8 = arith.constant 0 : index
      %c0_9 = arith.constant 0 : index
      %12 = vector.load %arg6[%c0_8, %c0_9] : memref<8x128xf32, #tpu.memory_space<vmem>>, vector<8x128xf32>
      tpu.vector_store %arg6[%c0_8, %c0_9], %11 {strides = array<i32>} : memref<8x128xf32, #tpu.memory_space<vmem>>, vector<8x128xf32>,
    } else {
    }
    %c0_i32_4 = arith.constant 0 : i32
    %6 = arith.cmpi ne, %arg2, %c0_i32_4 : i32
    %7 = arith.extui %6 : i1 to i32
    %c0_i32_5 = arith.constant 0 : i32
    %8 = arith.cmpi ne, %7, %c0_i32_5 : i32
    scf.if %8 {
      %c0_6 = arith.constant 0 : index
      %c0_7 = arith.constant 0 : index
      %9 = vector.load %arg6[%c0_6, %c0_7] : memref<8x128xf32, #tpu.memory_space<vmem>>, vector<8x128xf32>
      %10 = arith.addf %9, %2 : vector<8x128xf32>
      %c0_8 = arith.constant 0 : index
      %c0_9 = arith.constant 0 : index
      %11 = vector.load %arg6[%c0_8, %c0_9] : memref<8x128xf32, #tpu.memory_space<vmem>>, vector<8x128xf32>
      tpu.vector_store %arg6[%c0_8, %c0_9], %10 {strides = array<i32>} : memref<8x128xf32, #tpu.memory_space<vmem>>, vector<8x128xf32>,
    } else {
    }
    return
  }
  func.func @transform_0(%arg0: i32, %arg1: i32, %arg2: i32) -> (i32, i32) {
    %c0_i32 = arith.constant 0 : i32
    return %arg0, %arg2 : i32, i32
  }
  func.func @transform_1(%arg0: i32, %arg1: i32, %arg2: i32) -> (i32, i32) {
    %c0_i32 = arith.constant 0 : i32
    return %arg2, %arg1 : i32, i32
  }
  func.func @transform_2(%arg0: i32, %arg1: i32, %arg2: i32) -> (i32, i32) {
    %c0_i32 = arith.constant 0 : i32
    %c0_i32_0 = arith.constant 0 : i32
    return %c0_i32, %arg1 : i32, i32
  }
  func.func @transform_3(%arg0: i32, %arg1: i32, %arg2: i32) -> (i32, i32) {
    %c0_i32 = arith.constant 0 : i32
    return %arg0, %arg1 : i32, i32
  }
}

</mosaic_0001>

<bundles_post_ra>
// kernel: _linear_forward.1
= control target key start
LH: loop header
LB: loop body
LE: loop exit
PB: predicated region body
PF: predicated region fallthrough
CT: control target
= control target key end

     0   :  { %8 = vsyncpa [#allocation3], 0  ;;  %s195_s0 = inlined_call_operand.vmem [shape: f32[8,128], index: 0, kind: input, shape index: {}]   ;;  %s196_s1 = inlined_call_operand.hbm [shape: f32[128,128], index: 1, kind: input, shape index: {}]   ;;  %s197_s2 = inlined_call_operand.vmem [shape: f32[1,128], index: 2, kind: input, shape index: {}]   ;;  %s198_s3 = inlined_call_operand.hbm [shape: f32[8,128], index: 3, kind: output, shape index: {}]  }
   0x1   :  { %9 = vsyncpa [#allocation4], 0  ;;  %s16_s14 = sshll.u32 %s196_s1, 4  ;;  %s159_s15 = smov [#allocation2]   ;;  %s17_s14 = int_to_ptr.hbm [resolvable:$true] %s16_s14 }
   0x2   :  { %s18_s16 = sshll.u32 %s159_s15, 4  ;;  %s160_s17 = smov 128   ;;  %s19_s16 = int_to_ptr.vmem [resolvable:$true] %s18_s16 }
   0x3   :  { %s161_s18 = smov 8  }
   0x4   :  { %24 = dma.hbm_to_vmem [thread:$0]  %s17_s14, 2048, %s19_s16, [#allocation3], %s160_s17, %s160_s17, %s161_s18  }
   0x5   :  { %155 = dma.done.wait [#allocation3], 2048  }
   0x6   :  { %156 = vsyncadd [#allocation3], 4294965248  ;;  %v47_v0 = vld [vmem:[#allocation2 + $0x78] sm:$0xff]  ;;  %v46_v1 = vld [vmem:[#allocation2 + $0x70] sm:$0xff]  ;;  %s162_s22 = smov [#allocation5]   ;;  %s92_s26 = sshll.u32 %s198_s3, 4  ;;  %s93_s26 = int_to_ptr.hbm [resolvable:$true] %s92_s26 }
   0x7   :  { %48 = vmatpush.msra.mxu0 %v47_v0  ;;  %v45_v2 = vld [vmem:[#allocation2 + $0x68] sm:$0xff]  ;;  %v44_v3 = vld [vmem:[#allocation2 + $0x60] sm:$0xff]  ;;  %v43_v4 = vld [vmem:[#allocation2 + $0x58] sm:$0xff]  ;;  %s90_s23 = sshll.u32 %s162_s22, 4  ;;  %s91_s23 = int_to_ptr.vmem [resolvable:$true] %s90_s23 }
   0x8   :  { %v42_v5 = vld [vmem:[#allocation2 + $0x50] sm:$0xff]  ;;  %v41_v6 = vld [vmem:[#allocation2 + $0x48] sm:$0xff]  ;;  %v40_v7 = vld [vmem:[#allocation2 + $0x40] sm:$0xff] }
   0x9   :  { %49 = vmatpush.msra.mxu0 %v46_v1  ;;  %v39_v8 = vld [vmem:[#allocation2 + $0x38] sm:$0xff]  ;;  %v38_v9 = vld [vmem:[#allocation2 + $0x30] sm:$0xff]  ;;  %v37_v10 = vld [vmem:[#allocation2 + $0x28] sm:$0xff] }
   0xa   :  { %v36_v11 = vld [vmem:[#allocation2 + $0x20] sm:$0xff]  ;;  %v35_v12 = vld [vmem:[#allocation2 + $0x18] sm:$0xff]  ;;  %v34_v13 = vld [vmem:[#allocation2 + $0x10] sm:$0xff] }
   0xb   :  { %50 = vmatpush.msra.mxu0 %v45_v2  ;;  %v33_v14 = vld [vmem:[#allocation2 + $0x8] sm:$0xff]  ;;  %v32_v15 = vld [vmem:[#allocation2] sm:$0xff] }
   0xc   :  { %v31_v16 = vld [vmem:[%s195_s0] sm:$0xff] }
   0xd   :  { %51 = vmatpush.msra.mxu0 %v44_v3  ;;  %v106_v17 = vld [vmem:[%s197_s2] ss:$0 sm:$0xff] }
   0xf   :  { %52 = vmatpush.msra.mxu0 %v43_v4 }
  0x11   :  { %53 = vmatpush.msra.mxu0 %v42_v5 }
  0x13   :  { %54 = vmatpush.msra.mxu0 %v41_v6 }
  0x15   :  { %55 = vmatpush.msra.mxu0 %v40_v7 }
  0x17   :  { %56 = vmatpush.msra.mxu0 %v39_v8 }
  0x19   :  { %57 = vmatpush.msra.mxu0 %v38_v9 }
  0x1b   :  { %58 = vmatpush.msra.mxu0 %v37_v10 }
  0x1d   :  { %59 = vmatpush.msra.mxu0 %v36_v11 }
  0x1f   :  { %60 = vmatpush.msra.mxu0 %v35_v12 }
  0x21   :  { %61 = vmatpush.msra.mxu0 %v34_v13 }
  0x23   :  { %62 = vmatpush.msra.mxu0 %v33_v14 }
  0x25   :  { %63 = vmatpush.msra.mxu0 %v32_v15 }
  0x26   :  { %64 = vmatmul.f32.vlgmr.msra.gmra.mxu0 %v31_v16 }
  0xa3   :  { %v65_v18 = vpop.f32.mrf.mxu0 }
  0xa4   :  { %v76_v19 = vadd.f32 %v106_v17, %v65_v18 }
  0xa6   :  { %77 = vst [vmem:[#allocation5] sm:$0xff] %v76_v19 }
  0xa7   :  { %95 = dma.vmem_to_hbm [thread:$0]  %s91_s23, 128, %s93_s26, [#allocation4]  }
  0xa8   :  { %157 = dma.done.wait [#allocation4], 128  }
  0xa9   :  { %158 = vsyncadd [#allocation4], 4294967168 }
  0xaa   :  { %100 = vsyncpa [#allocation3], 1 }
  0xab   :  { %101 = vsyncpa [#allocation4], 1 }

</bundles_post_ra>
